<compile_context>
chip_gen: v7x
topology: tpu7x:2x2x1
jax: 0.10.0
libtpu: 0.0.40
codegen_flags: <defaults>
</compile_context>

<pallas_src>
import jax
import jax.numpy as jnp
from jax.experimental import pallas as pl
from jax.experimental.pallas import tpu as pltpu


def _copy_kernel(x_ref, o_ref):
    # D_EEG_LT.forward is identity; one VMEM load + store per block.
    # TODO(synk): for a pure-copy benchmark (no fused compute) a
    # memory_space=pl.ANY + pltpu.make_async_copy HBM->HBM variant would skip
    # the VMEM/vreg round-trip entirely; the VMEM-staged form is kept as the
    # scaffold where real per-block compute would be fused.
    o_ref[...] = x_ref[...]


def _sublane_granularity(itemsize: int) -> int:
    # 8 sublanes of 32-bit; sub-32-bit dtypes pack along sublanes
    # (bf16 -> 16, int8 -> 32) so blocks never hit partial-sublane stores.
    return 8 * max(1, 4 // itemsize)


def _vmem_capacity_bytes() -> int:
    try:
        return int(pltpu.get_tpu_info().vmem_capacity_bytes)
    except Exception:
        return 64 * 1024 * 1024  # conservative default (v7x per-TC VMEM)


def _generation_budgets():
    """(per-block byte budget, vmem_limit_bytes) gated on chip generation."""
    vmem = _vmem_capacity_bytes()
    if vmem >= 96 * 1024 * 1024:
        # v5e / v6e: 128 MiB physical VMEM -> big blocks, 64 MiB scoped limit.
        return 8 * 1024 * 1024, 64 * 1024 * 1024
    # v7x: 64 MiB per-TC VMEM. 4 MiB blocks x 4 live buffers (in+out, double
    # buffered) = 16 MiB, comfortably inside a 32 MiB scoped limit.
    return 4 * 1024 * 1024, 32 * 1024 * 1024


def d_eeg_lt_forward(x: jax.Array) -> jax.Array:
    """Faithful (and fastest) implementation of D_EEG_LT.forward: identity.

    The identity path should not launch a kernel at all — returning `x`
    removes 100% of the copy cost.
    """
    return x


def d_eeg_lt_forward_materialized(
    x: jax.Array, *, small_block_bytes: int = 4 * 1024 * 1024
) -> jax.Array:
    """Explicit Pallas copy of `x` (scaffold for fusing real work later)."""
    orig_shape = x.shape
    total = x.size
    itemsize = jnp.dtype(x.dtype).itemsize
    total_bytes = total * itemsize

    if total == 0:
        return x

    budget_bytes, vmem_limit = _generation_budgets()
    sub = _sublane_granularity(itemsize)

    # ---- small tensors: one whole-array, lane-dense block (no grid) --------
    if total_bytes <= small_block_bytes:
        lane = total
        if total % 128 == 0:
            for k in range(8, -1, -1):  # 32768, 16384, ..., 128
                cand = 128 << k
                if total % cand == 0:
                    lane = cand
                    break
        x2 = x.reshape(total // lane, lane)
        y2 = pl.pallas_call(
            _copy_kernel,
            out_shape=jax.ShapeDtypeStruct(x2.shape, x.dtype),
        )(x2)
        return y2.reshape(orig_shape)

    # ---- large tensors: lane-dense tiled path (never a whole-array block) --
    # Widest power-of-two lane (multiple of 128) that divides `total`; if none
    # does, fall back to a fixed lane and pad the flattened length.
    lane = 2048
    for k in range(8, -1, -1):  # 32768 .. 128
        cand = 128 << k
        if total % cand == 0:
            lane = cand
            break

    rows_needed = pl.cdiv(total, lane)

    # Largest row tile under the per-block budget, multiple of the sublane
    # granularity.
    row_tile_max = max(sub, (budget_bytes // (lane * itemsize)) // sub * sub)

    # Even grid with >= 2 steps so the "parallel" axis splits across both
    # v7x TensorCores; padding (sliced off afterwards) absorbs raggedness.
    grid = max(2, pl.cdiv(rows_needed, row_tile_max))
    if grid % 2:
        grid += 1
    row_tile = pl.cdiv(pl.cdiv(rows_needed, grid), sub) * sub  # <= row_tile_max
    padded_rows = grid * row_tile
    padded_total = padded_rows * lane

    x_flat = x.reshape(-1)
    if padded_total != total:
        x_flat = jnp.pad(x_flat, (0, padded_total - total))
    x2 = x_flat.reshape(padded_rows, lane)

    y2 = pl.pallas_call(
        _copy_kernel,
        out_shape=jax.ShapeDtypeStruct((padded_rows, lane), x.dtype),
        grid_spec=pltpu.PrefetchScalarGridSpec(
            num_scalar_prefetch=0,
            grid=(grid,),
            in_specs=[pl.BlockSpec((row_tile, lane), lambda i: (i, 0))],
            out_specs=pl.BlockSpec((row_tile, lane), lambda i: (i, 0)),
        ),
        # No input_output_aliases: the caller keeps `x` live, so aliasing would
        # force XLA to insert a defensive full copy (a net regression).
        compiler_params=pltpu.CompilerParams(
            dimension_semantics=("parallel",),
            vmem_limit_bytes=vmem_limit,
        ),
    )(x2)

    y_flat = y2.reshape(-1)
    if padded_total != total:
        y_flat = y_flat[:total]
    return y_flat.reshape(orig_shape)


if __name__ == "__main__":
    key = jax.random.PRNGKey(0)
    # Small NCHW input consistent with an EEG-latent discriminator:
    # batch=2, channels=4, spatial=16x16.
    x = jax.random.normal(key, (2, 4, 16, 16), dtype=jnp.float32)
    x = jax.block_until_ready(x)

    # Zero-cost identity path (the actual module semantics).
    y_fast = d_eeg_lt_forward(x)
    assert y_fast.shape == x.shape and y_fast.dtype == x.dtype

    # Pallas copy-kernel path (scaffold), small-tensor whole-block branch.
    y_small = jax.block_until_ready(d_eeg_lt_forward_materialized(x))
    assert y_small.shape == x.shape and y_small.dtype == x.dtype
    assert bool(jnp.array_equal(y_small, x))

    # Exercise the tiled (padded, even-grid) branch on the same small input by
    # shrinking the small-block threshold.
    y_tiled = jax.block_until_ready(
        d_eeg_lt_forward_materialized(x, small_block_bytes=1024)
    )
    assert y_tiled.shape == x.shape and y_tiled.dtype == x.dtype
    assert bool(jnp.array_equal(y_tiled, x))

    assert bool(jnp.array_equal(y_fast, x))
    print("KERNEL_OK")
</pallas_src>

<mosaic_0001>
module attributes {stable_mosaic.version = 11 : i64} {
  func.func @_copy_kernel(%arg0: memref<1x2048xf32, #tpu.memory_space<vmem>>, %arg1: memref<1x2048xf32, #tpu.memory_space<vmem>>) attributes {dimension_semantics = [], scalar_prefetch = 0 : i64, scratch_operands = 0 : i64, tpu.core_type = #tpu.core_type<tc>} {
    %c0 = arith.constant 0 : index
    %c0_0 = arith.constant 0 : index
    %0 = vector.load %arg0[%c0, %c0_0] : memref<1x2048xf32, #tpu.memory_space<vmem>>, vector<1x2048xf32>
    %c0_1 = arith.constant 0 : index
    %c0_2 = arith.constant 0 : index
    %1 = vector.load %arg1[%c0_1, %c0_2] : memref<1x2048xf32, #tpu.memory_space<vmem>>, vector<1x2048xf32>
    tpu.vector_store %arg1[%c0_1, %c0_2], %0 {strides = array<i32>} : memref<1x2048xf32, #tpu.memory_space<vmem>>, vector<1x2048xf32>,
    return
  }
}

</mosaic_0001>

<bundles_post_ra>
// kernel: tpu_custom_call.1
= control target key start
LH: loop header
LB: loop body
LE: loop exit
PB: predicated region body
PF: predicated region fallthrough
CT: control target
= control target key end

     0   :  { %6 = vsyncpa [#allocation3], 0  ;;  %s126_s0 = inlined_call_operand.hbm [shape: f32[1,2048], index: 0, kind: input, shape index: {}]   ;;  %s127_s1 = inlined_call_operand.hbm [shape: f32[1,2048], index: 1, kind: output, shape index: {}]  }
   0x1   :  { %7 = vsyncpa [#allocation4], 0  ;;  %s90_s6 = smov [#allocation2]   ;;  %s42_s10 = scalar_lea.hbm %s126_s0, 256 }
   0x2   :  { %s14_s7 = sshll.u32 %s90_s6, 4  ;;  %p43_p0 = scmp.ne.s32.totalorder %s126_s0, %s42_s10  ;;  %s15_s7 = int_to_ptr.vmem [resolvable:$true] %s14_s7 }
   0x3   :  { %p46_p1 = scmp.lt.u32.totalorder %s42_s10, %s126_s0 }
   0x5   :  { %p48_p2 = pnand %p46_p1, %p43_p0 }
   0x7   :  { %51 = shalt.err (!%p48_p2)
}
   0x8   :  { %s52_s15 = scalar_lea.vmem %s15_s7, 256  ;;  %p57_p4 = scmp.lt.s32.totalorder %s15_s7, %s15_s7 }
   0x9   :  { %p53_p3 = scmp.ne.s32.totalorder %s15_s7, %s52_s15  ;;  %p58_p5 = scmp.lt.s32.totalorder %s52_s15, %s52_s15 }
   0xb   :  { %p59_p6 = por %p58_p5, %p57_p4 }
   0xd   :  { %p60_p7 = pnand %p59_p6, %p53_p3 }
   0xf   :  { %63 = shalt.err (!%p60_p7)
}
  0x10   :  { %17 = dma.hbm_to_vmem [thread:$0]  %s126_s0, 256, %s15_s7, [#allocation3]  }
  0x11   :  { %86 = dma.done.wait [#allocation3], 256  }
  0x12   :  { %87 = vsyncadd [#allocation3], 4294967040  ;;  %s91_s18 = smov [#allocation5]   ;;  %v21_v0 = vld [vmem:[#allocation2] sm:$0xff]  ;;  %v22_v1 = vld [vmem:[#allocation2 + $0x8] sm:$0xff] }
  0x13   :  { %s31_s19 = sshll.u32 %s91_s18, 4  ;;  %23 = vst [vmem:[#allocation5] sm:$0xff] %v21_v0  ;;  %24 = vst [vmem:[#allocation5 + $0x8] sm:$0xff] %v22_v1  ;;  %s32_s19 = int_to_ptr.vmem [resolvable:$true] %s31_s19 }
  0x14   :  { %s64_s20 = scalar_lea.vmem %s32_s19, 256  ;;  %p69_p9 = scmp.lt.s32.totalorder %s32_s19, %s32_s19 }
  0x15   :  { %p65_p8 = scmp.ne.s32.totalorder %s32_s19, %s64_s20  ;;  %p70_p10 = scmp.lt.s32.totalorder %s64_s20, %s64_s20 }
  0x17   :  { %p71_p11 = por %p70_p10, %p69_p9 }
  0x19   :  { %p72_p12 = pnand %p71_p11, %p65_p8 }
  0x1b   :  { %75 = shalt.err (!%p72_p12)
}
  0x1c   :  { %s76_s0 = scalar_lea.hbm %s127_s1, 256 }
  0x1d   :  { %p77_p13 = scmp.ne.s32.totalorder %s127_s1, %s76_s0  ;;  %p80_p0 = scmp.lt.u32.totalorder %s76_s0, %s127_s1 }
  0x1f   :  { %p82_p1 = pnand %p80_p0, %p77_p13 }
  0x21   :  { %85 = shalt.err (!%p82_p1)
}
  0x22   :  { %34 = dma.vmem_to_hbm [thread:$0]  %s32_s19, 256, %s127_s1, [#allocation4]  }
  0x23   :  { %88 = dma.done.wait [#allocation4], 256  }
  0x24   :  { %89 = vsyncadd [#allocation4], 4294967040 }
  0x25   :  { %38 = vsyncpa [#allocation3], 1 }
  0x26   :  { %39 = vsyncpa [#allocation4], 1 }

</bundles_post_ra>
